<compile_context>
chip_gen: v7x
topology: tpu7x:2x2x1
jax: 0.10.0
libtpu: 0.0.40
codegen_flags: <defaults>
</compile_context>

<pallas_src>
import functools

import jax
import jax.numpy as jnp
from jax.experimental import pallas as pl
from jax.experimental.pallas import tpu as pltpu


# ---------------------------------------------------------------------------
# Tiling / compiler configuration
# ---------------------------------------------------------------------------
# Tile caps sized for bf16 operands with double buffering:
#   2 * (TM*TK + TK*TN + TM*TN) * 2B  ~= 2.5 MiB live, fits 64 MiB/TC (v7x) and
# comfortably fits v5e/v6e.  At the toy shapes below every dimension is smaller
# than its cap, so each kernel degenerates to one full-array block per grid step
# (always a legal BlockSpec).
TM_CAP = 256      # row tile (sublane-aligned, multiple of 8)
TN_CAP = 512      # col tile (lane-aligned, multiple of 128)
TK_CAP = 512      # reduction tile (lane-aligned, multiple of 128)
VMEM_LIMIT_BYTES = 64 * 1024 * 1024   # <= physical VMEM on v5e / v6e / v7x


def _compiler_params(dimension_semantics):
    return pltpu.CompilerParams(
        dimension_semantics=dimension_semantics,
        vmem_limit_bytes=VMEM_LIMIT_BYTES,
    )


def _pick_tile(dim, cap, align):
    """Largest `align`-aligned tile <= cap that evenly divides `dim`.
    Falls back to the whole dim (a full-extent block is always legal)."""
    if dim <= cap:
        return dim
    t = (cap // align) * align
    while t >= align:
        if dim % t == 0:
            return t
        t -= align
    return dim


def _heads_per_block(num_heads, head_dim, hidden):
    """Smallest head packing whose packed width (hpb*dH) is lane-dense-legal:
    a multiple of 128 lanes, or the full hidden width."""
    for hpb in range(1, num_heads + 1):
        if num_heads % hpb:
            continue
        w = hpb * head_dim
        if w % 128 == 0 or w == hidden:
            return hpb
    return num_heads  # hpb*dH == hidden is always legal


def _gelu(x):
    # exact (erf-based) GELU, matches torch / BERT gelu
    return 0.5 * x * (1.0 + jax.lax.erf(x * jnp.float32(0.7071067811865476)))


# ---------------------------------------------------------------------------
# Pallas kernels
# ---------------------------------------------------------------------------
def _matmul_kernel(x_ref, w_ref, b_ref, o_ref, acc_ref, *, activation):
    """Tiled o = act(x @ w + b); K-reduction grid axis 2, f32 accumulator."""
    @pl.when(pl.program_id(2) == 0)
    def _init():
        acc_ref[...] = jnp.zeros_like(acc_ref)

    # operands stay in their native (bf16) dtype; MXU accumulates in f32
    acc_ref[...] += jnp.dot(x_ref[...], w_ref[...], preferred_element_type=jnp.float32)

    @pl.when(pl.program_id(2) == pl.num_programs(2) - 1)
    def _finalize():
        y = acc_ref[...] + b_ref[...].astype(jnp.float32)
        if activation == "gelu":
            y = _gelu(y)
        elif activation == "relu":
            y = jnp.maximum(y, 0.0)
        o_ref[...] = y.astype(o_ref.dtype)


def _dense_res_ln_kernel(x_ref, w_ref, b_ref, r_ref, g_ref, bt_ref, o_ref, acc_ref, *, eps):
    """Tiled o = LayerNorm(x @ w + b + residual); K-reduction grid axis 1."""
    @pl.when(pl.program_id(1) == 0)
    def _init():
        acc_ref[...] = jnp.zeros_like(acc_ref)

    acc_ref[...] += jnp.dot(x_ref[...], w_ref[...], preferred_element_type=jnp.float32)

    @pl.when(pl.program_id(1) == pl.num_programs(1) - 1)
    def _finalize():
        y = acc_ref[...] + b_ref[...].astype(jnp.float32) + r_ref[...].astype(jnp.float32)
        mu = jnp.mean(y, axis=-1, keepdims=True)
        yc = y - mu
        var = jnp.mean(yc * yc, axis=-1, keepdims=True)
        o_ref[...] = (yc * jax.lax.rsqrt(var + eps) * g_ref[...].astype(jnp.float32)
                      + bt_ref[...].astype(jnp.float32)).astype(o_ref.dtype)


def _embed_kernel(x_ref, lng_ref, lnb_ref, w_ref, b_ref, emb_ref, g_ref, bt_ref, o_ref,
                  *, eps_in, eps_out):
    """Fused LinearLayer (LN -> dense -> ReLU) + embedding add + LN."""
    x = x_ref[...].astype(jnp.float32)
    mu = jnp.mean(x, axis=-1, keepdims=True)
    xc = x - mu
    var = jnp.mean(xc * xc, axis=-1, keepdims=True)
    xn = (xc * jax.lax.rsqrt(var + eps_in) * lng_ref[...].astype(jnp.float32)
          + lnb_ref[...].astype(jnp.float32))
    y = jnp.dot(xn.astype(w_ref.dtype), w_ref[...], preferred_element_type=jnp.float32)
    y = jnp.maximum(y + b_ref[...].astype(jnp.float32), 0.0)
    y = y + emb_ref[...].astype(jnp.float32)
    mu = jnp.mean(y, axis=-1, keepdims=True)
    yc = y - mu
    var = jnp.mean(yc * yc, axis=-1, keepdims=True)
    o_ref[...] = (yc * jax.lax.rsqrt(var + eps_out) * g_ref[...].astype(jnp.float32)
                  + bt_ref[...].astype(jnp.float32)).astype(o_ref.dtype)


def _attention_kernel(qkv_ref, mask_ref, o_ref, *, scale, head_dim, heads_per_block):
    """One (batch, head-block): softmax(q k^T * scale + mask_bias) @ v per packed head.

    qkv_ref: (1, L, 3, hpb*dH)  (column-sliced view of the fused QKV activation)
    mask_ref: (1, 1, 1, L)       o_ref: (1, L, hpb*dH)  (head-merged context slab)
    """
    # additive bias built in-kernel from the (1, L) mask row — never materialized in HBM
    bias = (1.0 - mask_ref[0, 0].astype(jnp.float32)) * jnp.float32(-10000.0)   # (1, L)
    qkv = qkv_ref[0]                                            # (L, 3, hpb*dH)
    outs = []
    for h in range(heads_per_block):                            # static unroll
        sl = slice(h * head_dim, (h + 1) * head_dim)
        q = qkv[:, 0, sl]                                       # (L, dH), native dtype
        k = qkv[:, 1, sl]
        v = qkv[:, 2, sl]
        # contract last dims directly (no explicit k.T transpose)
        s = jax.lax.dot_general(q, k, (((1,), (1,)), ((), ())),
                                preferred_element_type=jnp.float32) * jnp.float32(scale)
        s = s + bias
        m = jnp.max(s, axis=-1, keepdims=True)
        p = jnp.exp(s - m)
        p = p * pl.reciprocal(jnp.sum(p, axis=-1, keepdims=True), approx=True)
        outs.append(jnp.dot(p.astype(v.dtype), v, preferred_element_type=jnp.float32))
    ctx = outs[0] if len(outs) == 1 else jnp.concatenate(outs, axis=-1)
    # single lane-dense, unmasked store of the whole head-block slab
    o_ref[0] = ctx.astype(o_ref.dtype)
    # TODO(synk): for very long sequences switch to an online-softmax (flash) variant;
    # here the full (L, L) score tile fits VMEM.


# ---------------------------------------------------------------------------
# pallas_call wrappers
# ---------------------------------------------------------------------------
def dense(x2d, w, b, activation="none"):
    """Tiled matmul with optional activation. x:(M,K) w:(K,N) b:(N,)."""
    M, K = x2d.shape
    N = w.shape[1]
    tm = _pick_tile(M, TM_CAP, 8)
    tn = _pick_tile(N, TN_CAP, 128)
    tk = _pick_tile(K, TK_CAP, 128)
    return pl.pallas_call(
        functools.partial(_matmul_kernel, activation=activation),
        out_shape=jax.ShapeDtypeStruct((M, N), x2d.dtype),
        grid=(M // tm, N // tn, K // tk),
        in_specs=[
            pl.BlockSpec((tm, tk), lambda i, j, k: (i, k)),
            pl.BlockSpec((tk, tn), lambda i, j, k: (k, j)),
            pl.BlockSpec((1, tn), lambda i, j, k: (0, j)),
        ],
        out_specs=pl.BlockSpec((tm, tn), lambda i, j, k: (i, j)),
        scratch_shapes=[pltpu.VMEM((tm, tn), jnp.float32)],
        compiler_params=_compiler_params(("parallel", "parallel", "arbitrary")),
    )(x2d, w, b.reshape(1, N))


def dense_residual_ln(x2d, w, b, res2d, gamma, beta, eps):
    """Tiled o = LayerNorm(x @ w + b + res). Output kept full-width for the LN."""
    M, K = x2d.shape
    N = w.shape[1]
    tm = _pick_tile(M, TM_CAP, 8)
    tk = _pick_tile(K, TK_CAP, 128)
    return pl.pallas_call(
        functools.partial(_dense_res_ln_kernel, eps=eps),
        out_shape=jax.ShapeDtypeStruct((M, N), x2d.dtype),
        grid=(M // tm, K // tk),
        in_specs=[
            pl.BlockSpec((tm, tk), lambda i, k: (i, k)),
            pl.BlockSpec((tk, N), lambda i, k: (k, 0)),
            pl.BlockSpec((1, N), lambda i, k: (0, 0)),
            pl.BlockSpec((tm, N), lambda i, k: (i, 0)),
            pl.BlockSpec((1, N), lambda i, k: (0, 0)),
            pl.BlockSpec((1, N), lambda i, k: (0, 0)),
        ],
        out_specs=pl.BlockSpec((tm, N), lambda i, k: (i, 0)),
        scratch_shapes=[pltpu.VMEM((tm, N), jnp.float32)],
        compiler_params=_compiler_params(("parallel", "arbitrary")),
    )(x2d, w, b.reshape(1, N), res2d, gamma.reshape(1, N), beta.reshape(1, N))


def linear_embed(x2d, lin_ln_g, lin_ln_b, lin_w, lin_b, emb2d, emb_ln_g, emb_ln_b):
    """Fused LinearLayer + BertEmbeddings front-end: one pallas_call."""
    M, Din = x2d.shape
    H = lin_w.shape[1]
    tm = _pick_tile(M, TM_CAP, 8)
    return pl.pallas_call(
        functools.partial(_embed_kernel, eps_in=1e-5, eps_out=1e-12),
        out_shape=jax.ShapeDtypeStruct((M, H), x2d.dtype),
        grid=(M // tm,),
        in_specs=[
            pl.BlockSpec((tm, Din), lambda i: (i, 0)),
            pl.BlockSpec((1, Din), lambda i: (0, 0)),
            pl.BlockSpec((1, Din), lambda i: (0, 0)),
            pl.BlockSpec((Din, H), lambda i: (0, 0)),
            pl.BlockSpec((1, H), lambda i: (0, 0)),
            pl.BlockSpec((tm, H), lambda i: (i, 0)),
            pl.BlockSpec((1, H), lambda i: (0, 0)),
            pl.BlockSpec((1, H), lambda i: (0, 0)),
        ],
        out_specs=pl.BlockSpec((tm, H), lambda i: (i, 0)),
        compiler_params=_compiler_params(("parallel",)),
    )(x2d, lin_ln_g.reshape(1, Din), lin_ln_b.reshape(1, Din), lin_w,
      lin_b.reshape(1, H), emb2d, emb_ln_g.reshape(1, H), emb_ln_b.reshape(1, H))


def attention(qkv3, mask4d, num_heads, head_dim, heads_per_block):
    """qkv3: (B, L, 3, H) [free reshape of the fused QKV dense output];
    mask4d: (B, 1, 1, L)  ->  head-merged context (B, L, H)."""
    B, L, _, H = qkv3.shape
    W = heads_per_block * head_dim
    scale = 1.0 / float(head_dim) ** 0.5
    return pl.pallas_call(
        functools.partial(_attention_kernel, scale=scale, head_dim=head_dim,
                          heads_per_block=heads_per_block),
        out_shape=jax.ShapeDtypeStruct((B, L, H), qkv3.dtype),
        grid=(B, num_heads // heads_per_block),
        in_specs=[
            # head-block column slice of q/k/v, no HBM transpose required
            pl.BlockSpec((1, L, 3, W), lambda b, hb: (b, 0, 0, hb)),
            # mask indexed by batch only
            pl.BlockSpec((1, 1, 1, L), lambda b, hb: (b, 0, 0, 0)),
        ],
        out_specs=pl.BlockSpec((1, L, W), lambda b, hb: (b, 0, hb)),
        compiler_params=_compiler_params(("parallel", "parallel")),
    )(qkv3, mask4d)


# ---------------------------------------------------------------------------
# Parameters (deterministic, synthetic) — stored in bf16
# ---------------------------------------------------------------------------
def init_params(key, config, input_dim, dtype=jnp.bfloat16):
    H = config["hidden_size"]
    I = config["intermediate_size"]

    def nrm(k, shape):
        return (0.02 * jax.random.normal(k, shape, jnp.float32)).astype(dtype)

    def zeros(shape):
        return jnp.zeros(shape, dtype)

    def ones(shape):
        return jnp.ones(shape, dtype)

    keys = iter(jax.random.split(key, 4 + 8 * config["num_hidden_layers"]))
    p = {
        # LinearLayer
        "lin_ln_g": ones((input_dim,)), "lin_ln_b": zeros((input_dim,)),
        "lin_w": nrm(next(keys), (input_dim, H)), "lin_b": zeros((H,)),
        # BertEmbeddings
        "pos_emb": nrm(next(keys), (config["max_position_embeddings"], H)),
        "tok_emb": nrm(next(keys), (config["type_vocab_size"], H)),
        "emb_ln_g": ones((H,)), "emb_ln_b": zeros((H,)),
        "layers": [],
    }
    for _ in range(config["num_hidden_layers"]):
        layer = {
            # fused QKV projection weight (H, 3H); columns ordered [q | k | v],
            # each section head-major, matching the (B, L, 3, H) view in the forward.
            "qkv_w": nrm(next(keys), (H, 3 * H)),
            "qkv_b": zeros((3 * H,)),
            # attention-output weight in standard (H, H) layout; heads are merged
            # by the attention kernel's output layout, so a plain dense suffices.
            "ao_w": nrm(next(keys), (H, H)),
            "ao_b": zeros((H,)),
            "attn_ln_g": ones((H,)), "attn_ln_b": zeros((H,)),
            "i_w": nrm(next(keys), (H, I)), "i_b": zeros((I,)),
            "o_w": nrm(next(keys), (I, H)), "o_b": zeros((H,)),
            "out_ln_g": ones((H,)), "out_ln_b": zeros((H,)),
        }
        p["layers"].append(layer)
    return p


# ---------------------------------------------------------------------------
# Forward pass (tiny glue in JAX, everything heavy in Pallas)
# ---------------------------------------------------------------------------
def encoder_forward(params, features, position_ids, token_type_ids, attention_mask, config):
    B, L, D_in = features.shape
    H = config["hidden_size"]
    nH = config["num_attention_heads"]
    dH = H // nH
    hpb = _heads_per_block(nH, dH, H)
    dtype = params["lin_w"].dtype

    # --- LinearLayer + BertEmbeddings fused into a single kernel.
    # Embedding gathers are tiny -> plain-JAX glue; add + both LayerNorms are in-kernel.
    emb2d = (params["pos_emb"][position_ids.reshape(-1)]
             + params["tok_emb"][token_type_ids.reshape(-1)])                  # (B*L, H)
    x2d = linear_embed(features.reshape(B * L, D_in).astype(dtype),
                       params["lin_ln_g"], params["lin_ln_b"],
                       params["lin_w"], params["lin_b"],
                       emb2d, params["emb_ln_g"], params["emb_ln_b"])          # (B*L, H)

    # --- attention mask stays (B, 1, 1, L); the (1-mask)*-10000 bias is built inside
    #     the attention kernel, never broadcast to (B*nH, L, L) in HBM.
    mask4d = attention_mask.astype(jnp.float32).reshape(B, 1, 1, L)

    # --- BertEncoder layers: 5 pallas_calls per layer, no HBM transposes
    for layer in params["layers"]:
        qkv = dense(x2d, layer["qkv_w"], layer["qkv_b"])                       # (B*L, 3H)
        qkv3 = qkv.reshape(B, L, 3, H)                                         # free reshape
        ctx = attention(qkv3, mask4d, nH, dH, hpb)                             # (B, L, H) head-merged
        x2d = dense_residual_ln(ctx.reshape(B * L, H),
                                layer["ao_w"], layer["ao_b"], x2d,
                                layer["attn_ln_g"], layer["attn_ln_b"], eps=1e-12)
        inter = dense(x2d, layer["i_w"], layer["i_b"], activation="gelu")      # (B*L, I)
        x2d = dense_residual_ln(inter, layer["o_w"], layer["o_b"], x2d,
                                layer["out_ln_g"], layer["out_ln_b"], eps=1e-12)

    return x2d.reshape(B, L, H)


# ---------------------------------------------------------------------------
if __name__ == "__main__":
    # TODO(synk): dropout layers are identity (eval mode); no Pallas equivalent needed.
    config = dict(
        hidden_size=32,
        num_hidden_layers=2,
        num_attention_heads=4,
        intermediate_size=64,
        max_position_embeddings=16,
        type_vocab_size=2,
    )
    input_dim = 16
    B, L = 2, 8

    key = jax.random.PRNGKey(0)
    k_feat, k_param = jax.random.split(key)

    features = jax.random.normal(k_feat, (B, L, input_dim), jnp.float32)
    position_ids = jnp.broadcast_to(jnp.arange(L, dtype=jnp.int32)[None, :], (B, L))
    token_type_ids = jnp.zeros((B, L), jnp.int32)
    attention_mask = jnp.ones((B, L), jnp.float32).at[1, 6:].set(0.0)  # pad last 2 tokens of batch 1

    # bf16 weights/activations (MXU-native on v6e/v7x); LN/softmax/GELU math stays f32 in-kernel.
    params = init_params(k_param, config, input_dim, dtype=jnp.bfloat16)

    out = encoder_forward(params, features, position_ids, token_type_ids, attention_mask, config)
    out = jax.block_until_ready(out)

    assert out.shape == (B, L, config["hidden_size"]), out.shape
    assert bool(jnp.all(jnp.isfinite(out.astype(jnp.float32))))
    print("KERNEL_OK")
</pallas_src>

<mosaic_0001>
module attributes {stable_mosaic.version = 11 : i64} {
  func.func @_embed_kernel(%arg0: i32, %arg1: memref<16x16xbf16, #tpu.memory_space<vmem>>, %arg2: memref<1x16xbf16, #tpu.memory_space<vmem>>, %arg3: memref<1x16xbf16, #tpu.memory_space<vmem>>, %arg4: memref<16x32xbf16, #tpu.memory_space<vmem>>, %arg5: memref<1x32xbf16, #tpu.memory_space<vmem>>, %arg6: memref<16x32xbf16, #tpu.memory_space<vmem>>, %arg7: memref<1x32xbf16, #tpu.memory_space<vmem>>, %arg8: memref<1x32xbf16, #tpu.memory_space<vmem>>, %arg9: memref<16x32xbf16, #tpu.memory_space<vmem>>) attributes {dimension_semantics = [#tpu.dimension_semantics<parallel>], iteration_bounds = array<i64: 1>, scalar_prefetch = 0 : i64, scratch_operands = 0 : i64, tpu.core_type = #tpu.core_type<tc>, window_params = [{transform_indices = @transform_0, window_bounds = array<i64: 16, 16>}, {pipeline_mode = #tpu.pipeline_mode<synchronous>, transform_indices = @transform_1, window_bounds = array<i64: 1, 16>}, {pipeline_mode = #tpu.pipeline_mode<synchronous>, transform_indices = @transform_2, window_bounds = array<i64: 1, 16>}, {pipeline_mode = #tpu.pipeline_mode<synchronous>, transform_indices = @transform_3, window_bounds = array<i64: 16, 32>}, {pipeline_mode = #tpu.pipeline_mode<synchronous>, transform_indices = @transform_4, window_bounds = array<i64: 1, 32>}, {transform_indices = @transform_5, window_bounds = array<i64: 16, 32>}, {pipeline_mode = #tpu.pipeline_mode<synchronous>, transform_indices = @transform_6, window_bounds = array<i64: 1, 32>}, {pipeline_mode = #tpu.pipeline_mode<synchronous>, transform_indices = @transform_7, window_bounds = array<i64: 1, 32>}, {transform_indices = @transform_8, window_bounds = array<i64: 16, 32>}]} {
    %c0 = arith.constant 0 : index
    %c0_0 = arith.constant 0 : index
    %0 = vector.load %arg1[%c0, %c0_0] : memref<16x16xbf16, #tpu.memory_space<vmem>>, vector<16x16xbf16>
    %1 = arith.extf %0 : vector<16x16xbf16> to vector<16x16xf32>
    %cst = arith.constant dense<0.000000e+00> : vector<16xf32>
    %2 = vector.multi_reduction <add>, %1, %cst [1] : vector<16x16xf32> to vector<16xf32>
    %3 = vector.shape_cast %2 : vector<16xf32> to vector<16x1xf32>
    %cst_1 = arith.constant 1.600000e+01 : f32
    %4 = vector.broadcast %cst_1 : f32 to vector<16x1xf32>
    %5 = arith.divf %3, %4 : vector<16x1xf32>
    %6 = vector.broadcast %5 : vector<16x1xf32> to vector<16x16xf32>
    %7 = arith.subf %1, %6 : vector<16x16xf32>
    %8 = arith.mulf %7, %7 : vector<16x16xf32>
    %cst_2 = arith.constant dense<0.000000e+00> : vector<16xf32>
    %9 = vector.multi_reduction <add>, %8, %cst_2 [1] : vector<16x16xf32> to vector<16xf32>
    %10 = vector.shape_cast %9 : vector<16xf32> to vector<16x1xf32>
    %cst_3 = arith.constant 1.600000e+01 : f32
    %11 = vector.broadcast %cst_3 : f32 to vector<16x1xf32>
    %12 = arith.divf %10, %11 : vector<16x1xf32>
    %cst_4 = arith.constant 9.99999974E-6 : f32
    %13 = vector.broadcast %cst_4 : f32 to vector<16x1xf32>
    %14 = arith.addf %12, %13 : vector<16x1xf32>
    %15 = math.rsqrt %14 : vector<16x1xf32>
    %16 = vector.broadcast %15 : vector<16x1xf32> to vector<16x16xf32>
    %17 = arith.mulf %7, %16 : vector<16x16xf32>
    %c0_5 = arith.constant 0 : index
    %c0_6 = arith.constant 0 : index
    %18 = vector.load %arg2[%c0_5, %c0_6] : memref<1x16xbf16, #tpu.memory_space<vmem>>, vector<1x16xbf16>
    %19 = arith.extf %18 : vector<1x16xbf16> to vector<1x16xf32>
    %20 = vector.broadcast %19 : vector<1x16xf32> to vector<16x16xf32>
    %21 = arith.mulf %17, %20 : vector<16x16xf32>
    %c0_7 = arith.constant 0 : index
    %c0_8 = arith.constant 0 : index
    %22 = vector.load %arg3[%c0_7, %c0_8] : memref<1x16xbf16, #tpu.memory_space<vmem>>, vector<1x16xbf16>
    %23 = arith.extf %22 : vector<1x16xbf16> to vector<1x16xf32>
    %24 = vector.broadcast %23 : vector<1x16xf32> to vector<16x16xf32>
    %25 = arith.addf %21, %24 : vector<16x16xf32>
    %26 = arith.truncf %25 : vector<16x16xf32> to vector<16x16xbf16>
    %c0_9 = arith.constant 0 : index
    %c0_10 = arith.constant 0 : index
    %27 = vector.load %arg4[%c0_9, %c0_10] : memref<16x32xbf16, #tpu.memory_space<vmem>>, vector<16x32xbf16>
    %cst_11 = arith.constant dense<0.000000e+00> : vector<16x32xf32>
    %28 = tpu.matmul %26, %27, %cst_11 {dimension_numbers = #tpu.dot_dimension_numbers<[1], [0], [0], [1], [0, 0, 1, 1], [], []>} : vector<16x16xbf16>, vector<16x32xbf16>, vector<16x32xf32> -> vector<16x32xf32>
    %c0_12 = arith.constant 0 : index
    %c0_13 = arith.constant 0 : index
    %29 = vector.load %arg5[%c0_12, %c0_13] : memref<1x32xbf16, #tpu.memory_space<vmem>>, vector<1x32xbf16>
    %30 = arith.extf %29 : vector<1x32xbf16> to vector<1x32xf32>
    %31 = vector.broadcast %30 : vector<1x32xf32> to vector<16x32xf32>
    %32 = arith.addf %28, %31 : vector<16x32xf32>
    %cst_14 = arith.constant 0.000000e+00 : f32
    %33 = vector.broadcast %cst_14 : f32 to vector<16x32xf32>
    %34 = arith.maximumf %32, %33 : vector<16x32xf32>
    %c0_15 = arith.constant 0 : index
    %c0_16 = arith.constant 0 : index
    %35 = vector.load %arg6[%c0_15, %c0_16] : memref<16x32xbf16, #tpu.memory_space<vmem>>, vector<16x32xbf16>
    %36 = arith.extf %35 : vector<16x32xbf16> to vector<16x32xf32>
    %37 = arith.addf %34, %36 : vector<16x32xf32>
    %cst_17 = arith.constant dense<0.000000e+00> : vector<16xf32>
    %38 = vector.multi_reduction <add>, %37, %cst_17 [1] : vector<16x32xf32> to vector<16xf32>
    %39 = vector.shape_cast %38 : vector<16xf32> to vector<16x1xf32>
    %cst_18 = arith.constant 3.200000e+01 : f32
    %40 = vector.broadcast %cst_18 : f32 to vector<16x1xf32>
    %41 = arith.divf %39, %40 : vector<16x1xf32>
    %42 = vector.broadcast %41 : vector<16x1xf32> to vector<16x32xf32>
    %43 = arith.subf %37, %42 : vector<16x32xf32>
    %44 = arith.mulf %43, %43 : vector<16x32xf32>
    %cst_19 = arith.constant dense<0.000000e+00> : vector<16xf32>
    %45 = vector.multi_reduction <add>, %44, %cst_19 [1] : vector<16x32xf32> to vector<16xf32>
    %46 = vector.shape_cast %45 : vector<16xf32> to vector<16x1xf32>
    %cst_20 = arith.constant 3.200000e+01 : f32
    %47 = vector.broadcast %cst_20 : f32 to vector<16x1xf32>
    %48 = arith.divf %46, %47 : vector<16x1xf32>
    %cst_21 = arith.constant 9.99999996E-13 : f32
    %49 = vector.broadcast %cst_21 : f32 to vector<16x1xf32>
    %50 = arith.addf %48, %49 : vector<16x1xf32>
    %51 = math.rsqrt %50 : vector<16x1xf32>
    %52 = vector.broadcast %51 : vector<16x1xf32> to vector<16x32xf32>
    %53 = arith.mulf %43, %52 : vector<16x32xf32>
    %c0_22 = arith.constant 0 : index
    %c0_23 = arith.constant 0 : index
    %54 = vector.load %arg7[%c0_22, %c0_23] : memref<1x32xbf16, #tpu.memory_space<vmem>>, vector<1x32xbf16>
    %55 = arith.extf %54 : vector<1x32xbf16> to vector<1x32xf32>
    %56 = vector.broadcast %55 : vector<1x32xf32> to vector<16x32xf32>
    %57 = arith.mulf %53, %56 : vector<16x32xf32>
    %c0_24 = arith.constant 0 : index
    %c0_25 = arith.constant 0 : index
    %58 = vector.load %arg8[%c0_24, %c0_25] : memref<1x32xbf16, #tpu.memory_space<vmem>>, vector<1x32xbf16>
    %59 = arith.extf %58 : vector<1x32xbf16> to vector<1x32xf32>
    %60 = vector.broadcast %59 : vector<1x32xf32> to vector<16x32xf32>
    %61 = arith.addf %57, %60 : vector<16x32xf32>
    %62 = arith.truncf %61 : vector<16x32xf32> to vector<16x32xbf16>
    %c0_26 = arith.constant 0 : index
    %c0_27 = arith.constant 0 : index
    %63 = vector.load %arg9[%c0_26, %c0_27] : memref<16x32xbf16, #tpu.memory_space<vmem>>, vector<16x32xbf16>
    tpu.vector_store %arg9[%c0_26, %c0_27], %62 {strides = array<i32>} : memref<16x32xbf16, #tpu.memory_space<vmem>>, vector<16x32xbf16>,
    return
  }
  func.func @transform_0(%arg0: i32) -> (i32, i32) {
    %c0_i32 = arith.constant 0 : i32
    %c0_i32_0 = arith.constant 0 : i32
    return %arg0, %c0_i32 : i32, i32
  }
  func.func @transform_1(%arg0: i32) -> (i32, i32) {
    %c0_i32 = arith.constant 0 : i32
    %c0_i32_0 = arith.constant 0 : i32
    %c0_i32_1 = arith.constant 0 : i32
    return %c0_i32, %c0_i32_0 : i32, i32
  }
  func.func @transform_2(%arg0: i32) -> (i32, i32) {
    %c0_i32 = arith.constant 0 : i32
    %c0_i32_0 = arith.constant 0 : i32
    %c0_i32_1 = arith.constant 0 : i32
    return %c0_i32, %c0_i32_0 : i32, i32
  }
  func.func @transform_3(%arg0: i32) -> (i32, i32) {
    %c0_i32 = arith.constant 0 : i32
    %c0_i32_0 = arith.constant 0 : i32
    %c0_i32_1 = arith.constant 0 : i32
    return %c0_i32, %c0_i32_0 : i32, i32
  }
  func.func @transform_4(%arg0: i32) -> (i32, i32) {
    %c0_i32 = arith.constant 0 : i32
    %c0_i32_0 = arith.constant 0 : i32
    %c0_i32_1 = arith.constant 0 : i32
    return %c0_i32, %c0_i32_0 : i32, i32
  }
  func.func @transform_5(%arg0: i32) -> (i32, i32) {
    %c0_i32 = arith.constant 0 : i32
    %c0_i32_0 = arith.constant 0 : i32
    return %arg0, %c0_i32 : i32, i32
  }
  func.func @transform_6(%arg0: i32) -> (i32, i32) {
    %c0_i32 = arith.constant 0 : i32
    %c0_i32_0 = arith.constant 0 : i32
    %c0_i32_1 = arith.constant 0 : i32
    return %c0_i32, %c0_i32_0 : i32, i32
  }
  func.func @transform_7(%arg0: i32) -> (i32, i32) {
    %c0_i32 = arith.constant 0 : i32
    %c0_i32_0 = arith.constant 0 : i32
    %c0_i32_1 = arith.constant 0 : i32
    return %c0_i32, %c0_i32_0 : i32, i32
  }
  func.func @transform_8(%arg0: i32) -> (i32, i32) {
    %c0_i32 = arith.constant 0 : i32
    %c0_i32_0 = arith.constant 0 : i32
    return %arg0, %c0_i32 : i32, i32
  }
}

</mosaic_0001>

<bundles_post_ra>
// kernel: tpu_custom_call.1
= control target key start
LH: loop header
LB: loop body
LE: loop exit
PB: predicated region body
PF: predicated region fallthrough
CT: control target
= control target key end

     0   :  { %13 = vsyncpa [#allocation3], 0  ;;  %s769_s0 = inlined_call_operand.hbm [shape: bf16[16,16], index: 0, kind: input, shape index: {}]   ;;  %s770_s1 = inlined_call_operand.hbm [shape: bf16[1,16], index: 1, kind: input, shape index: {}]   ;;  %s771_s2 = inlined_call_operand.hbm [shape: bf16[1,16], index: 2, kind: input, shape index: {}]   ;;  %s772_s3 = inlined_call_operand.hbm [shape: bf16[16,32], index: 3, kind: input, shape index: {}]   ;;  %s773_s4 = inlined_call_operand.hbm [shape: bf16[1,32], index: 4, kind: input, shape index: {}]   ;;  %s774_s5 = inlined_call_operand.hbm [shape: bf16[16,32], index: 5, kind: input, shape index: {}]   ;;  %s775_s6 = inlined_call_operand.hbm [shape: bf16[1,32], index: 6, kind: input, shape index: {}]   ;;  %s776_s7 = inlined_call_operand.hbm [shape: bf16[1,32], index: 7, kind: input, shape index: {}]   ;;  %s777_s8 = inlined_call_operand.hbm [shape: bf16[16,32], index: 8, kind: output, shape index: {}]  }
   0x1   :  { %14 = vsyncpa [#allocation6], 0 }
   0x2   :  { %15 = vsyncpa [#allocation9], 0 }
   0x3   :  { %16 = vsyncpa [#allocation12], 0 }
   0x4   :  { %17 = vsyncpa [#allocation15], 0 }
   0x5   :  { %18 = vsyncpa [#allocation4], 0  ;;  %s575_s27 = smov [#allocation5]   ;;  %s365_s9 = scalar_lea.hbm %s770_s1, 16 }
   0x6   :  { %s37_s28 = sshll.u32 %s575_s27, 4  ;;  %p366_p0 = scmp.ne.s32.totalorder %s770_s1, %s365_s9  ;;  %s38_s28 = int_to_ptr.vmem [resolvable:$true] %s37_s28 }
   0x7   :  { %p369_p1 = scmp.lt.u32.totalorder %s365_s9, %s770_s1 }
   0x9   :  { %p371_p2 = pnand %p369_p1, %p366_p0 }
   0xb   :  { %374 = shalt.err (!%p371_p2)
}
   0xc   :  { %s375_s14 = scalar_lea.vmem %s38_s28, 16  ;;  %s379_s15 = scalar_lea.vmem %s38_s28, 32 }
   0xd   :  { %p376_p3 = scmp.ne.s32.totalorder %s38_s28, %s375_s14  ;;  %p380_p4 = scmp.lt.s32.totalorder %s38_s28, %s38_s28 }
   0xe   :  { %p381_p5 = scmp.lt.s32.totalorder %s379_s15, %s375_s14 }
  0x10   :  { %p382_p6 = por %p381_p5, %p380_p4 }
  0x12   :  { %p383_p7 = pnand %p382_p6, %p376_p3 }
  0x14   :  { %386 = shalt.err (!%p383_p7)
}
  0x15   :  { %40 = dma.hbm_to_vmem [thread:$0]  %s770_s1, 16, %s38_s28, [#allocation6]  }
  0x16   :  { %s576_s18 = smov [#allocation8]   ;;  %s577_s20 = smov [#allocation11]  }
  0x17   :  { %s56_s19 = sshll.u32 %s576_s18, 4  ;;  %s78_s21 = sshll.u32 %s577_s20, 4  ;;  %s57_s19 = int_to_ptr.vmem [resolvable:$true] %s56_s19  ;;  %s79_s21 = int_to_ptr.vmem [resolvable:$true] %s78_s21 }
  0x18   :  { %s387_s24 = scalar_lea.hbm %s772_s3, 128 }
  0x19   :  { %p388_p8 = scmp.ne.s32.totalorder %s772_s3, %s387_s24  ;;  %p391_p9 = scmp.lt.u32.totalorder %s387_s24, %s772_s3 }
  0x1b   :  { %p393_p10 = pnand %p391_p9, %p388_p8 }
  0x1d   :  { %396 = shalt.err (!%p393_p10)
}
  0x1e   :  { %s397_s1 = scalar_lea.vmem %s57_s19, 128  ;;  %p402_p12 = scmp.lt.s32.totalorder %s57_s19, %s57_s19 }
  0x1f   :  { %p398_p11 = scmp.ne.s32.totalorder %s57_s19, %s397_s1  ;;  %p403_p13 = scmp.lt.s32.totalorder %s397_s1, %s397_s1 }
  0x21   :  { %p404_p0 = por %p403_p13, %p402_p12 }
  0x23   :  { %p405_p1 = pnand %p404_p0, %p398_p11 }
  0x25   :  { %408 = shalt.err (!%p405_p1)
}
  0x26   :  { %s578_s28 = smov 64   ;;  %s579_s30 = smov 4  }
  0x27   :  { %62 = dma.hbm_to_vmem [thread:$0]  %s772_s3, 128, %s57_s19, [#allocation9], %s578_s28, %s578_s28, %s579_s30  }
  0x28   :  { %s409_s13 = scalar_lea.hbm %s774_s5, 128 }
  0x29   :  { %p410_p2 = scmp.ne.s32.totalorder %s774_s5, %s409_s13  ;;  %p413_p3 = scmp.lt.u32.totalorder %s409_s13, %s774_s5 }
  0x2b   :  { %p415_p4 = pnand %p413_p3, %p410_p2 }
  0x2d   :  { %418 = shalt.err (!%p415_p4)
}
  0x2e   :  { %s419_s18 = scalar_lea.vmem %s79_s21, 128  ;;  %p424_p6 = scmp.lt.s32.totalorder %s79_s21, %s79_s21 }
  0x2f   :  { %p420_p5 = scmp.ne.s32.totalorder %s79_s21, %s419_s18  ;;  %p425_p7 = scmp.lt.s32.totalorder %s419_s18, %s419_s18 }
  0x31   :  { %p426_p8 = por %p425_p7, %p424_p6 }
  0x33   :  { %p427_p9 = pnand %p426_p8, %p420_p5 }
  0x35   :  { %430 = shalt.err (!%p427_p9)
}
  0x36   :  { %84 = dma.hbm_to_vmem [thread:$0]  %s774_s5, 128, %s79_s21, [#allocation12], %s578_s28, %s578_s28, %s579_s30  }
  0x37   :  { %s580_s20 = smov [#allocation2]   ;;  %s581_s23 = smov [#allocation7]  }
  0x38   :  { %s24_s22 = sshll.u32 %s580_s20, 4  ;;  %s47_s24 = sshll.u32 %s581_s23, 4  ;;  %s25_s22 = int_to_ptr.vmem [resolvable:$true] %s24_s22  ;;  %s48_s24 = int_to_ptr.vmem [resolvable:$true] %s47_s24 }
  0x39   :  { %s431_s27 = scalar_lea.hbm %s769_s0, 128 }
  0x3a   :  { %p432_p10 = scmp.ne.s32.totalorder %s769_s0, %s431_s27  ;;  %p435_p11 = scmp.lt.u32.totalorder %s431_s27, %s769_s0 }
  0x3c   :  { %p437_p12 = pnand %p435_p11, %p432_p10 }
  0x3e   :  { %440 = shalt.err (!%p437_p12)
}
  0x3f   :  { %s441_s5 = scalar_lea.vmem %s25_s22, 128  ;;  %p446_p0 = scmp.lt.s32.totalorder %s25_s22, %s25_s22 }
  0x40   :  { %p442_p13 = scmp.ne.s32.totalorder %s25_s22, %s441_s5  ;;  %p447_p1 = scmp.lt.s32.totalorder %s441_s5, %s441_s5 }
  0x42   :  { %p448_p2 = por %p447_p1, %p446_p0 }
  0x44   :  { %p449_p3 = pnand %p448_p2, %p442_p13 }
  0x46   :  { %452 = shalt.err (!%p449_p3)
}
  0x47   :  { %30 = dma.hbm_to_vmem [thread:$0]  %s769_s0, 128, %s25_s22, [#allocation3], %s578_s28, %s578_s28, %s579_s30  }
  0x48   :  { %s453_s14 = scalar_lea.hbm %s771_s2, 16 }
  0x49   :  { %p454_p4 = scmp.ne.s32.totalorder %s771_s2, %s453_s14  ;;  %p457_p5 = scmp.lt.u32.totalorder %s453_s14, %s771_s2 }
  0x4b   :  { %p459_p6 = pnand %p457_p5, %p454_p4 }
  0x4d   :  { %462 = shalt.err (!%p459_p6)
}
  0x4e   :  { %s463_s3 = scalar_lea.vmem %s48_s24, 16  ;;  %s467_s19 = scalar_lea.vmem %s48_s24, 32 }
  0x4f   :  { %p464_p7 = scmp.ne.s32.totalorder %s48_s24, %s463_s3  ;;  %p468_p8 = scmp.lt.s32.totalorder %s48_s24, %s48_s24 }
  0x50   :  { %p469_p9 = scmp.lt.s32.totalorder %s467_s19, %s463_s3 }
  0x52   :  { %p470_p10 = por %p469_p9, %p468_p8 }
  0x54   :  { %p471_p11 = pnand %p470_p10, %p464_p7 }
  0x56   :  { %474 = shalt.err (!%p471_p11)
}
  0x57   :  { %50 = dma.hbm_to_vmem [thread:$0]  %s771_s2, 16, %s48_s24, [#allocation6]  }
  0x58   :  { %s582_s22 = smov [#allocation10]   ;;  %s583_s25 = smov [#allocation13]  }
  0x59   :  { %s69_s23 = sshll.u32 %s582_s22, 4  ;;  %s91_s26 = sshll.u32 %s583_s25, 4  ;;  %s70_s23 = int_to_ptr.vmem [resolvable:$true] %s69_s23  ;;  %s92_s26 = int_to_ptr.vmem [resolvable:$true] %s91_s26 }
  0x5a   :  { %s475_s1 = scalar_lea.hbm %s773_s4, 16 }
  0x5b   :  { %p476_p12 = scmp.ne.s32.totalorder %s773_s4, %s475_s1  ;;  %p479_p13 = scmp.lt.u32.totalorder %s475_s1, %s773_s4 }
  0x5d   :  { %p481_p0 = pnand %p479_p13, %p476_p12 }
  0x5f   :  { %484 = shalt.err (!%p481_p0)
}
  0x60   :  { %s485_s2 = scalar_lea.vmem %s70_s23, 16  ;;  %s489_s24 = scalar_lea.vmem %s70_s23, 32 }
  0x61   :  { %p486_p1 = scmp.ne.s32.totalorder %s70_s23, %s485_s2  ;;  %p490_p2 = scmp.lt.s32.totalorder %s70_s23, %s70_s23 }
  0x62   :  { %p491_p3 = scmp.lt.s32.totalorder %s489_s24, %s485_s2 }
  0x64   :  { %p492_p4 = por %p491_p3, %p490_p2 }
  0x66   :  { %p493_p5 = pnand %p492_p4, %p486_p1 }
  0x68   :  { %496 = shalt.err (!%p493_p5)
}
  0x69   :  { %72 = dma.hbm_to_vmem [thread:$0]  %s773_s4, 16, %s70_s23, [#allocation9]  }
  0x6a   :  { %s497_s15 = scalar_lea.hbm %s775_s6, 16 }
  0x6b   :  { %p498_p6 = scmp.ne.s32.totalorder %s775_s6, %s497_s15  ;;  %p501_p7 = scmp.lt.u32.totalorder %s497_s15, %s775_s6 }
  0x6d   :  { %p503_p8 = pnand %p501_p7, %p498_p6 }
  0x6f   :  { %506 = shalt.err (!%p503_p8)
}
  0x70   :  { %s507_s19 = scalar_lea.vmem %s92_s26, 16  ;;  %s511_s0 = scalar_lea.vmem %s92_s26, 32 }
  0x71   :  { %p508_p9 = scmp.ne.s32.totalorder %s92_s26, %s507_s19  ;;  %p512_p10 = scmp.lt.s32.totalorder %s92_s26, %s92_s26 }
  0x72   :  { %p513_p11 = scmp.lt.s32.totalorder %s511_s0, %s507_s19 }
  0x74   :  { %p514_p12 = por %p513_p11, %p512_p10 }
  0x76   :  { %p515_p13 = pnand %p514_p12, %p508_p9 }
  0x78   :  { %518 = shalt.err (!%p515_p13)
}
  0x79   :  { %94 = dma.hbm_to_vmem [thread:$0]  %s775_s6, 16, %s92_s26, [#allocation12]  }
  0x7a   :  { %s584_s22 = smov [#allocation14]   ;;  %s519_s29 = scalar_lea.hbm %s776_s7, 16 }
  0x7b   :  { %s101_s23 = sshll.u32 %s584_s22, 4  ;;  %p520_p0 = scmp.ne.s32.totalorder %s776_s7, %s519_s29  ;;  %s102_s23 = int_to_ptr.vmem [resolvable:$true] %s101_s23 }
  0x7c   :  { %p523_p1 = scmp.lt.u32.totalorder %s519_s29, %s776_s7 }
  0x7e   :  { %p525_p2 = pnand %p523_p1, %p520_p0 }
  0x80   :  { %528 = shalt.err (!%p525_p2)
}
  0x81   :  { %s529_s21 = scalar_lea.vmem %s102_s23, 16  ;;  %s533_s6 = scalar_lea.vmem %s102_s23, 32 }
  0x82   :  { %p530_p3 = scmp.ne.s32.totalorder %s102_s23, %s529_s21  ;;  %p534_p4 = scmp.lt.s32.totalorder %s102_s23, %s102_s23 }
  0x83   :  { %p535_p5 = scmp.lt.s32.totalorder %s533_s6, %s529_s21 }
  0x85   :  { %p536_p6 = por %p535_p5, %p534_p4 }
  0x87   :  { %p537_p7 = pnand %p536_p6, %p530_p3 }
  0x89   :  { %540 = shalt.err (!%p537_p7)
}
  0x8a   :  { %104 = dma.hbm_to_vmem [thread:$0]  %s776_s7, 16, %s102_s23, [#allocation15]  }
  0x8b   :  { %563 = dma.done.wait [#allocation3], 128  }
  0x8c   :  { %564 = vsyncadd [#allocation3], 4294967168 }
  0x8d   :  { %565 = dma.done.wait [#allocation6], 32  }
  0x8e   :  { %566 = vsyncadd [#allocation6], 4294967264 }
  0x8f   :  { %567 = dma.done.wait [#allocation9], 144  }
  0x90   :  { %568 = vsyncadd [#allocation9], 4294967152 }
  0x91   :  { %569 = dma.done.wait [#allocation12], 144  }
  0x92   :  { %570 = vsyncadd [#allocation12], 4294967152 }
  0x93   :  { %571 = dma.done.wait [#allocation15], 16  }
  0x94   :  { %572 = vsyncadd [#allocation15], 4294967280  ;;  %v328_v0 = vld [vmem:[#allocation2] sm:$0xff]   ;;  %vm134_vm0 = vcmask 130048   ;;  %v356_v15 = vld [vmem:[#allocation8] sm:$0xff]   ;;  %v585_v16 = vmov 0.0   ;;  %v164_v21 = vlaneseq }
  0x95   :  { %v329_v1 = vunpack.c.l.bf16 %v328_v0  ;;  %v330_v2 = vunpack.c.h.bf16 %v328_v0  ;;  %337 = vmatprep.subr.bf16.mxu0 %v585_v16  ;;  %vm586_vm1 = vmmov 0   ;;  %v162_v25 = vld [vmem:[#allocation5] sm:$0x1]  ;;  %v170_v28 = vld [vmem:[#allocation7] sm:$0x1]  ;;  %v332_v44 = vld [vmem:[#allocation11] sm:$0xff]  }
  0x96   :  { %339 = vmatprep.mubr.msk.bf16.mxu0 %vm586_vm1, %v585_v16  ;;  %338 = vmatpush3.bf16.msra.mxu0 %v356_v15  ;;  %v165_v24 = vshrl.u32 %v164_v21, 7  ;;  %v163_v26 = vunpack.c.l.bf16 %v162_v25  ;;  %v171_v32 = vunpack.c.l.bf16 %v170_v28  ;;  %v181_v41 = vld [vmem:[#allocation10] sm:$0x1]  ;;  %v333_v48 = vunpack.c.l.bf16 %v332_v44  ;;  %s587_s7 = smov [#allocation16]  }
  0x97   :  { %v135_v3 = vsel %vm134_vm0, %v329_v1, 0.0  ;;  %v138_v4 = vsel %vm134_vm0, %v330_v2, 0.0  ;;  %v182_v42 = vunpack.c.l.bf16 %v181_v41  ;;  %v334_v53 = vunpack.c.h.bf16 %v332_v44  ;;  %s305_s24 = sshll.u32 %s587_s7, 4  ;;  %s306_s24 = int_to_ptr.vmem [resolvable:$true] %s305_s24 }
  0x98   :  { %136 = vadd.xlane.f32.xlu0 %v135_v3  ;;  %v742_v27 = vsub.s32 0, %v165_v24  ;;  %vm245_vm2 = vcmask 261120   ;;  %vm297_vm3 = vcmask 257024   ;;  %s541_s11 = scalar_lea.vmem %s306_s24, 128  ;;  %p546_p9 = scmp.lt.s32.totalorder %s306_s24, %s306_s24 }
  0x99   :  { %p542_p8 = scmp.ne.s32.totalorder %s306_s24, %s541_s11  ;;  %p547_p10 = scmp.lt.s32.totalorder %s541_s11, %s541_s11 }
  0x9a   :  { %v167_v31 = vrot.slane %v163_v26, %v742_v27  ;;  %v175_v36 = vrot.slane %v171_v32, %v742_v27  ;;  %v186_v43 = vrot.slane %v182_v42, %v742_v27 }
  0x9b   :  { %p548_p11 = por %p547_p10, %p546_p9 }
  0x9c   :  { %139 = vadd.xlane.f32.xlu0 %v138_v4 }
  0x9d   :  { %p549_p12 = pnand %p548_p11, %p542_p8 }
 0x125   :  { %v137_v5 = vpop.xlane.xlu0 %136 }
 0x126   :  { %v142_v6 = vmul.f32 0.0625, %v137_v5 }
 0x128   :  { %v144_v7 = vsub.f32 %v329_v1, %v142_v6 }
 0x129   :  { %v140_v8 = vpop.xlane.xlu0 %139 }
 0x12a   :  { %v143_v9 = vmul.f32 0.0625, %v140_v8  ;;  %v146_v10 = vmul.f32 %v144_v7, %v144_v7 }
 0x12c   :  { %v145_v11 = vsub.f32 %v330_v2, %v143_v9  ;;  %v148_v12 = vsel %vm134_vm0, %v146_v10, 0.0 }
 0x12d   :  { %149 = vadd.xlane.f32.xlu1 %v148_v12  ;;  %v281_v12 = vld [vmem:[#allocation14] sm:$0x1] }
 0x12e   :  { %v147_v13 = vmul.f32 %v145_v11, %v145_v11 }
 0x130   :  { %v151_v14 = vsel %vm134_vm0, %v147_v13, 0.0 }
 0x131   :  { %152 = vadd.xlane.f32.xlu1 %v151_v14  ;;  %v282_v14 = vunpack.c.l.bf16 %v281_v12 }
 0x1ba   :  { %v150_v17 = vpop.xlane.xlu1 %149 }
 0x1bb   :  { %v154_v18 = vmul.f32 0.0625, %v150_v17 }
 0x1bd   :  { %v156_v19 = vadd.f32 1e-05, %v154_v18  ;;  %v286_v18 = vrot.slane %v282_v14, %v742_v27 }
 0x1be   :  { %v153_v20 = vpop.xlane.xlu1 %152 }
 0x1bf   :  { %357 = vrsqrt.f32 %v156_v19  ;;  %v155_v22 = vmul.f32 0.0625, %v153_v20 }
 0x1c1   :  { %v157_v23 = vadd.f32 1e-05, %v155_v22 }
 0x1c3   :  { %359 = vrsqrt.f32 %v157_v23 }
 0x1c9   :  { %v358_v29 = vpop.eup %357 }
 0x1ca   :  { %v160_v30 = vmul.f32 %v358_v29, %v144_v7 }
 0x1cc   :  { %v168_v35 = vmul.f32 %v167_v31, %v160_v30 }
 0x1cd   :  { %v360_v33 = vpop.eup %359 }
 0x1ce   :  { %v161_v34 = vmul.f32 %v360_v33, %v145_v11  ;;  %v176_v38 = vadd.f32 %v175_v36, %v168_v35  ;;  %v273_v11 = vld [vmem:[#allocation13] sm:$0x1] }
 0x1cf   :  { %v274_v13 = vunpack.c.l.bf16 %v273_v11 }
 0x1d0   :  { %v169_v37 = vmul.f32 %v167_v31, %v161_v34 }
 0x1d1   :  { %v278_v15 = vrot.slane %v274_v13, %v742_v27 }
 0x1d2   :  { %v177_v39 = vadd.f32 %v175_v36, %v169_v37 }
 0x1d4   :  { %v178_v40 = vpack.c.bf16 %v177_v39, %v176_v38 }
 0x1d6   :  { %340 = vmatmul.mubr.msk.bf16.vlgmr.msra.gmra.mrb[0].mxu0 %vm134_vm0, %v178_v40 }
 0x2a9   :  { %v230_v45 = vpop.f32.mrb[0].mxu0 }
 0x2aa   :  { %v231_v46 = vadd.f32 %v230_v45, %v186_v43  ;;  %v341_v47 = vpop.f32.mrb[1].mxu0 }
 0x2ab   :  { %v233_v49 = vpop.f32.mrb[2].mxu0 }
 0x2ac   :  { %v237_v50 = vmax.f32 %v231_v46, 0.0  ;;  %v234_v51 = vadd.f32 %v233_v49, %v186_v43  ;;  %v342_v52 = vpop.f32.mrb[3].mxu0 }
 0x2ae   :  { %v238_v54 = vmax.f32 %v234_v51, 0.0  ;;  %v243_v55 = vadd.f32 %v333_v48, %v237_v50 }
 0x2b0   :  { %v246_v56 = vsel %vm245_vm2, %v243_v55, 0.0  ;;  %v244_v57 = vadd.f32 %v334_v53, %v238_v54 }
 0x2b1   :  { %247 = vadd.xlane.f32.xlu0 %v246_v56 }
 0x2b2   :  { %v249_v58 = vsel %vm245_vm2, %v244_v57, 0.0 }
 0x2b3   :  { %250 = vadd.xlane.f32.xlu1 %v249_v58 }
 0x33e   :  { %v248_v59 = vpop.xlane.xlu0 %247 }
 0x33f   :  { %v253_v60 = vmul.f32 0.03125, %v248_v59 }
 0x340   :  { %v251_v61 = vpop.xlane.xlu1 %250 }
 0x341   :  { %v255_v62 = vsub.f32 %v243_v55, %v253_v60  ;;  %v254_v63 = vmul.f32 0.03125, %v251_v61 }
 0x343   :  { %v256_v0 = vsub.f32 %v244_v57, %v254_v63  ;;  %v257_v1 = vmul.f32 %v255_v62, %v255_v62 }
 0x345   :  { %v259_v2 = vsel %vm245_vm2, %v257_v1, 0.0  ;;  %v258_v3 = vmul.f32 %v256_v0, %v256_v0 }
 0x346   :  { %260 = vadd.xlane.f32.xlu0 %v259_v2 }
 0x347   :  { %v262_v4 = vsel %vm245_vm2, %v258_v3, 0.0 }
 0x348   :  { %263 = vadd.xlane.f32.xlu1 %v262_v4 }
 0x3d3   :  { %v261_v5 = vpop.xlane.xlu0 %260 }
 0x3d4   :  { %v265_v6 = vmul.f32 0.03125, %v261_v5 }
 0x3d5   :  { %v264_v7 = vpop.xlane.xlu1 %263 }
 0x3d6   :  { %v267_v8 = vadd.f32 1e-12, %v265_v6  ;;  %v266_v9 = vmul.f32 0.03125, %v264_v7 }
 0x3d8   :  { %361 = vrsqrt.f32 %v267_v8  ;;  %v268_v10 = vadd.f32 1e-12, %v266_v9 }
 0x3da   :  { %363 = vrsqrt.f32 %v268_v10 }
 0x3e2   :  { %v362_v16 = vpop.eup %361 }
 0x3e3   :  { %v271_v17 = vmul.f32 %v362_v16, %v255_v62 }
 0x3e4   :  { %v364_v19 = vpop.eup %363 }
 0x3e5   :  { %v272_v20 = vmul.f32 %v364_v19, %v256_v0  ;;  %v279_v21 = vmul.f32 %v278_v15, %v271_v17 }
 0x3e7   :  { %v280_v22 = vmul.f32 %v278_v15, %v272_v20  ;;  %v287_v23 = vadd.f32 %v286_v18, %v279_v21 }
 0x3e9   :  { %v288_v24 = vadd.f32 %v286_v18, %v280_v22  ;;  %v325_v25 = vpack.c.bf16 %v287_v23, %v287_v23 }
 0x3eb   :  { %v326_v26 = vpack.c.bf16 %v288_v24, %v288_v24  ;;  %298 = vst.msk [vmem:[#allocation16] sm:$0xf] %vm297_vm3, %v325_v25 }
 0x3ed   :  { %299 = vst.msk [vmem:[#allocation16 + $0x4] sm:$0xf] %vm297_vm3, %v326_v26 }
 0x3ee   :  { %552 = shalt.err (!%p549_p12)
}
 0x3ef   :  { %s553_s14 = scalar_lea.hbm %s777_s8, 128 }
 0x3f0   :  { %p554_p13 = scmp.ne.s32.totalorder %s777_s8, %s553_s14  ;;  %p557_p0 = scmp.lt.u32.totalorder %s553_s14, %s777_s8 }
 0x3f2   :  { %p559_p1 = pnand %p557_p0, %p554_p13 }
 0x3f4   :  { %562 = shalt.err (!%p559_p1)
}
 0x3f5   :  { %311 = dma.vmem_to_hbm [thread:$0]  %s306_s24, 128, %s777_s8, [#allocation4], %s578_s28, %s578_s28, %s579_s30  }
 0x3f6   :  { %573 = dma.done.wait [#allocation4], 128  }
 0x3f7   :  { %574 = vsyncadd [#allocation4], 4294967168 }
 0x3f8   :  { %315 = vsyncpa [#allocation3], 1 }
 0x3f9   :  { %316 = vsyncpa [#allocation6], 1 }
 0x3fa   :  { %317 = vsyncpa [#allocation9], 1 }
 0x3fb   :  { %318 = vsyncpa [#allocation12], 1 }
 0x3fc   :  { %319 = vsyncpa [#allocation15], 1 }
 0x3fd   :  { %320 = vsyncpa [#allocation4], 1 }

</bundles_post_ra>
